<compile_context>
chip_gen: v5e
topology: v5e:2x2
jax: 0.10.0
libtpu: 0.0.40
codegen_flags: <defaults>
</compile_context>

<pallas_src>
import math

import jax
import jax.numpy as jnp
from jax.experimental import pallas as pl
from jax.experimental.pallas import tpu as pltpu

_LANE = 128


def _round_up(x, m):
    return ((x + m - 1) // m) * m


def _nbytes(n_elems, dtype):
    return int(n_elems) * jnp.dtype(dtype).itemsize


def _vmem_budget_bytes():
    # Physical VMEM: 128 MiB (v5e/v6e), 64 MiB per TensorCore (v7x).
    try:
        cap = int(pltpu.get_tpu_info().vmem_capacity_bytes)
    except Exception:
        cap = 64 * 2**20  # conservative: assume v7x per-TC VMEM
    return int(cap * 0.85)


# ---------------------------------------------------------------------------
# Kernels
# ---------------------------------------------------------------------------

def _mlp_resident_kernel(x_ref, w1_ref, b1_ref, w2_ref, b2_ref, o_ref):
    """Single-pass MLP row tile; weights stay VMEM-resident across the grid."""
    # Feed the MXU the weights' native dtype (bf16 weights stay bf16);
    # accumulate / bias / relu in f32.
    x = x_ref[...].astype(w1_ref.dtype)
    h = jnp.dot(x, w1_ref[...], preferred_element_type=jnp.float32)
    h = jnp.maximum(h + b1_ref[...].astype(jnp.float32), 0.0)   # ReLU
    # dropout: identity (eval mode)
    y = jnp.dot(h.astype(w2_ref.dtype), w2_ref[...],
                preferred_element_type=jnp.float32)
    o_ref[...] = (y + b2_ref[...].astype(jnp.float32)).astype(o_ref.dtype)


def _mlp_tiled_kernel(x_ref, w1_ref, b1_ref, w2_ref, b2_ref, o_ref, acc_ref):
    """Fallback: hidden dim streamed as a trailing reduction grid axis."""
    k = pl.program_id(1)

    @pl.when(k == 0)
    def _():
        acc_ref[...] = jnp.zeros_like(acc_ref)

    x = x_ref[...].astype(w1_ref.dtype)
    h = jnp.dot(x, w1_ref[...], preferred_element_type=jnp.float32)
    h = jnp.maximum(h + b1_ref[...].astype(jnp.float32), 0.0)   # ReLU
    # dropout: identity (eval mode)
    acc_ref[...] += jnp.dot(h.astype(w2_ref.dtype), w2_ref[...],
                            preferred_element_type=jnp.float32)

    @pl.when(k == pl.num_programs(1) - 1)
    def _():
        o_ref[...] = (acc_ref[...]
                      + b2_ref[...].astype(jnp.float32)).astype(o_ref.dtype)


# ---------------------------------------------------------------------------
# Wrapper
# ---------------------------------------------------------------------------

def mlp_pallas(x, w1, b1, w2, b2, *, tm=512, tk=512):
    """x: [..., n_units]; w1: [n_units, hidden]; b1: [hidden];
    w2: [hidden, n_units]; b2: [n_units].  Returns [..., n_units]."""
    *lead, d_in = x.shape
    hidden = w1.shape[1]
    d_out = w2.shape[1]

    x2 = x.reshape(-1, d_in)
    n = x2.shape[0]
    out_dtype = x.dtype

    # ---- row tile: large, sublane-aligned, and >= 2 tiles when possible ----
    row_align = 16 if x2.dtype == jnp.bfloat16 else 8
    if n >= 2 * row_align:
        tm = min(tm, _round_up(pl.cdiv(n, 2), row_align))
    else:
        tm = min(tm, _round_up(max(n, 1), row_align))
    tm = max(tm, row_align)
    grid_rows = pl.cdiv(n, tm)      # partial last block masked by Pallas

    # ---- lane-dense output: pad output feature dim to a multiple of 128 ----
    d_out_p = _round_up(d_out, _LANE)
    if d_out_p != d_out:
        w2 = jnp.pad(w2, ((0, 0), (0, d_out_p - d_out)))
        b2 = jnp.pad(b2, (0, d_out_p - d_out))

    b1_2 = b1.reshape(1, hidden)
    b2_2 = b2.reshape(1, d_out_p)

    # ---- VMEM accounting (auto-pipelining double-buffers every operand) ----
    budget = _vmem_budget_bytes()

    def _resident_bytes():
        b = 0
        b += 2 * _nbytes(tm * d_in, x2.dtype)             # x row tile
        b += 2 * _nbytes(d_in * hidden, w1.dtype)         # W1 (resident)
        b += 2 * _nbytes(hidden, b1.dtype)                # b1
        b += 2 * _nbytes(hidden * d_out_p, w2.dtype)      # W2 (resident)
        b += 2 * _nbytes(d_out_p, b2.dtype)               # b2
        b += 2 * _nbytes(tm * d_out_p, out_dtype)         # output row tile
        b += _nbytes(tm * hidden, jnp.float32)            # h intermediate
        b += _nbytes(tm * d_out_p, jnp.float32)           # y intermediate
        return b

    use_resident = _resident_bytes() <= budget

    if use_resident:
        vmem_limit = min(budget, max(_resident_bytes() + (4 << 20), 32 << 20))
        out2 = pl.pallas_call(
            _mlp_resident_kernel,
            out_shape=jax.ShapeDtypeStruct((n, d_out_p), out_dtype),
            grid_spec=pltpu.PrefetchScalarGridSpec(
                num_scalar_prefetch=0,
                grid=(grid_rows,),
                in_specs=[
                    pl.BlockSpec((tm, d_in), lambda i: (i, 0)),         # x rows
                    pl.BlockSpec((d_in, hidden), lambda i: (0, 0)),     # W1 (const)
                    pl.BlockSpec((1, hidden), lambda i: (0, 0)),        # b1 (const)
                    pl.BlockSpec((hidden, d_out_p), lambda i: (0, 0)),  # W2 (const)
                    pl.BlockSpec((1, d_out_p), lambda i: (0, 0)),       # b2 (const)
                ],
                out_specs=pl.BlockSpec((tm, d_out_p), lambda i: (i, 0)),
            ),
            compiler_params=pltpu.CompilerParams(
                dimension_semantics=("parallel",),
                vmem_limit_bytes=int(vmem_limit)),
        )(x2, w1, b1_2, w2, b2_2)
    else:
        # Fallback: stream hidden dim (reduction axis last, f32 accumulator).
        tk = min(tk, hidden)
        if hidden % tk != 0:
            tk = hidden
        out2 = pl.pallas_call(
            _mlp_tiled_kernel,
            out_shape=jax.ShapeDtypeStruct((n, d_out_p), out_dtype),
            grid_spec=pltpu.PrefetchScalarGridSpec(
                num_scalar_prefetch=0,
                grid=(grid_rows, hidden // tk),
                in_specs=[
                    pl.BlockSpec((tm, d_in), lambda i, k: (i, 0)),      # x rows
                    pl.BlockSpec((d_in, tk), lambda i, k: (0, k)),      # W1 col tile
                    pl.BlockSpec((1, tk), lambda i, k: (0, k)),         # b1 tile
                    pl.BlockSpec((tk, d_out_p), lambda i, k: (k, 0)),   # W2 row tile
                    pl.BlockSpec((1, d_out_p), lambda i, k: (0, 0)),    # b2
                ],
                out_specs=pl.BlockSpec((tm, d_out_p), lambda i, k: (i, 0)),
                scratch_shapes=[pltpu.VMEM((tm, d_out_p), jnp.float32)],
            ),
            compiler_params=pltpu.CompilerParams(
                dimension_semantics=("parallel", "arbitrary"),
                vmem_limit_bytes=int(budget)),
        )(x2, w1, b1_2, w2, b2_2)

    if d_out_p != d_out:
        out2 = out2[:, :d_out]
    return out2.reshape(*lead, d_out)


# ---------------------------------------------------------------------------
# Reference + test
# ---------------------------------------------------------------------------

def _reference(x, w1, b1, w2, b2):
    xf = x.astype(jnp.float32)
    h = jnp.maximum(
        jnp.dot(xf, w1.astype(jnp.float32),
                precision=jax.lax.Precision.HIGHEST) + b1, 0.0)
    y = jnp.dot(h, w2.astype(jnp.float32),
                precision=jax.lax.Precision.HIGHEST) + b2
    return y.astype(x.dtype)


if __name__ == "__main__":
    B, S, n_units, hidden = 2, 8, 32, 2048
    key = jax.random.PRNGKey(0)
    kx, k1, kb1, k2, kb2 = jax.random.split(key, 5)

    x = jax.random.normal(kx, (B, S, n_units), dtype=jnp.float32)

    # Linear layer params (stored already transposed: [in, out]).
    w1 = jax.random.normal(k1, (n_units, hidden), dtype=jnp.float32) * 0.02
    b1 = jax.random.normal(kb1, (hidden,), dtype=jnp.float32) * 0.02
    w2 = jax.random.normal(k2, (hidden, n_units), dtype=jnp.float32) * 0.02
    b2 = jax.random.normal(kb2, (n_units,), dtype=jnp.float32) * 0.02

    out = mlp_pallas(x, w1, b1, w2, b2)
    out = jax.block_until_ready(out)

    ref = _reference(x, w1, b1, w2, b2)
    assert out.shape == (B, S, n_units)
    err = float(jnp.max(jnp.abs(out - ref)))
    assert jnp.allclose(out, ref, atol=2e-3, rtol=2e-3), err

    print("KERNEL_OK")
</pallas_src>

<mosaic_0001>
module attributes {stable_mosaic.version = 11 : i64} {
  func.func @_mlp_resident_kernel(%arg0: i32, %arg1: memref<8x32xf32, #tpu.memory_space<vmem>>, %arg2: memref<32x2048xf32, #tpu.memory_space<vmem>>, %arg3: memref<1x2048xf32, #tpu.memory_space<vmem>>, %arg4: memref<2048x128xf32, #tpu.memory_space<vmem>>, %arg5: memref<1x128xf32, #tpu.memory_space<vmem>>, %arg6: memref<8x128xf32, #tpu.memory_space<vmem>>) attributes {dimension_semantics = [#tpu.dimension_semantics<parallel>], iteration_bounds = array<i64: 2>, scalar_prefetch = 0 : i64, scratch_operands = 0 : i64, tpu.core_type = #tpu.core_type<tc>, window_params = [{transform_indices = @transform_0, window_bounds = array<i64: 8, 32>}, {pipeline_mode = #tpu.pipeline_mode<synchronous>, transform_indices = @transform_1, window_bounds = array<i64: 32, 2048>}, {pipeline_mode = #tpu.pipeline_mode<synchronous>, transform_indices = @transform_2, window_bounds = array<i64: 1, 2048>}, {pipeline_mode = #tpu.pipeline_mode<synchronous>, transform_indices = @transform_3, window_bounds = array<i64: 2048, 128>}, {pipeline_mode = #tpu.pipeline_mode<synchronous>, transform_indices = @transform_4, window_bounds = array<i64: 1, 128>}, {transform_indices = @transform_5, window_bounds = array<i64: 8, 128>}]} {
    %c0 = arith.constant 0 : index
    %c0_0 = arith.constant 0 : index
    %0 = vector.load %arg1[%c0, %c0_0] : memref<8x32xf32, #tpu.memory_space<vmem>>, vector<8x32xf32>
    %c0_1 = arith.constant 0 : index
    %c0_2 = arith.constant 0 : index
    %1 = vector.load %arg2[%c0_1, %c0_2] : memref<32x2048xf32, #tpu.memory_space<vmem>>, vector<32x2048xf32>
    %cst = arith.constant dense<0.000000e+00> : vector<8x2048xf32>
    %2 = tpu.matmul %0, %1, %cst {dimension_numbers = #tpu.dot_dimension_numbers<[1], [0], [0], [1], [0, 0, 1, 1], [], []>} : vector<8x32xf32>, vector<32x2048xf32>, vector<8x2048xf32> -> vector<8x2048xf32>
    %c0_3 = arith.constant 0 : index
    %c0_4 = arith.constant 0 : index
    %3 = vector.load %arg3[%c0_3, %c0_4] : memref<1x2048xf32, #tpu.memory_space<vmem>>, vector<1x2048xf32>
    %4 = vector.broadcast %3 : vector<1x2048xf32> to vector<8x2048xf32>
    %5 = arith.addf %2, %4 : vector<8x2048xf32>
    %cst_5 = arith.constant 0.000000e+00 : f32
    %6 = vector.broadcast %cst_5 : f32 to vector<8x2048xf32>
    %7 = arith.maximumf %5, %6 : vector<8x2048xf32>
    %c0_6 = arith.constant 0 : index
    %c0_7 = arith.constant 0 : index
    %8 = vector.load %arg4[%c0_6, %c0_7] : memref<2048x128xf32, #tpu.memory_space<vmem>>, vector<2048x128xf32>
    %cst_8 = arith.constant dense<0.000000e+00> : vector<8x128xf32>
    %9 = tpu.matmul %7, %8, %cst_8 {dimension_numbers = #tpu.dot_dimension_numbers<[1], [0], [0], [1], [0, 0, 1, 1], [], []>} : vector<8x2048xf32>, vector<2048x128xf32>, vector<8x128xf32> -> vector<8x128xf32>
    %c0_9 = arith.constant 0 : index
    %c0_10 = arith.constant 0 : index
    %10 = vector.load %arg5[%c0_9, %c0_10] : memref<1x128xf32, #tpu.memory_space<vmem>>, vector<1x128xf32>
    %11 = vector.broadcast %10 : vector<1x128xf32> to vector<8x128xf32>
    %12 = arith.addf %9, %11 : vector<8x128xf32>
    %c0_11 = arith.constant 0 : index
    %c0_12 = arith.constant 0 : index
    %13 = vector.load %arg6[%c0_11, %c0_12] : memref<8x128xf32, #tpu.memory_space<vmem>>, vector<8x128xf32>
    tpu.vector_store %arg6[%c0_11, %c0_12], %12 {strides = array<i32>} : memref<8x128xf32, #tpu.memory_space<vmem>>, vector<8x128xf32>,
    return
  }
  func.func @transform_0(%arg0: i32) -> (i32, i32) {
    %c0_i32 = arith.constant 0 : i32
    %c0_i32_0 = arith.constant 0 : i32
    return %arg0, %c0_i32 : i32, i32
  }
  func.func @transform_1(%arg0: i32) -> (i32, i32) {
    %c0_i32 = arith.constant 0 : i32
    %c0_i32_0 = arith.constant 0 : i32
    %c0_i32_1 = arith.constant 0 : i32
    return %c0_i32, %c0_i32_0 : i32, i32
  }
  func.func @transform_2(%arg0: i32) -> (i32, i32) {
    %c0_i32 = arith.constant 0 : i32
    %c0_i32_0 = arith.constant 0 : i32
    %c0_i32_1 = arith.constant 0 : i32
    return %c0_i32, %c0_i32_0 : i32, i32
  }
  func.func @transform_3(%arg0: i32) -> (i32, i32) {
    %c0_i32 = arith.constant 0 : i32
    %c0_i32_0 = arith.constant 0 : i32
    %c0_i32_1 = arith.constant 0 : i32
    return %c0_i32, %c0_i32_0 : i32, i32
  }
  func.func @transform_4(%arg0: i32) -> (i32, i32) {
    %c0_i32 = arith.constant 0 : i32
    %c0_i32_0 = arith.constant 0 : i32
    %c0_i32_1 = arith.constant 0 : i32
    return %c0_i32, %c0_i32_0 : i32, i32
  }
  func.func @transform_5(%arg0: i32) -> (i32, i32) {
    %c0_i32 = arith.constant 0 : i32
    %c0_i32_0 = arith.constant 0 : i32
    return %arg0, %c0_i32 : i32, i32
  }
}

</mosaic_0001>

<bundles_post_ra>
// kernel: tpu_custom_call.1
= control target key start
LH: loop header
LB: loop body
LE: loop exit
PB: predicated region body
PF: predicated region fallthrough
CT: control target
= control target key end

     0   :  { %10 = vsyncpa [#allocation3], 0  ;;  %s2000_s0 = inlined_call_operand.hbm [shape: f32[16,32], index: 0, kind: input, shape index: {}]   ;;  %s2001_s1 = inlined_call_operand.hbm [shape: f32[32,2048], index: 1, kind: input, shape index: {}]   ;;  %s2002_s2 = inlined_call_operand.hbm [shape: f32[1,2048], index: 2, kind: input, shape index: {}]   ;;  %s2003_s3 = inlined_call_operand.hbm [shape: f32[2048,128], index: 3, kind: input, shape index: {}]   ;;  %s2004_s4 = inlined_call_operand.vmem [shape: f32[1,128], index: 4, kind: input, shape index: {}]   ;;  %s2005_s5 = inlined_call_operand.hbm [shape: f32[16,128], index: 5, kind: output, shape index: {}]  }
   0x1   :  { %12 = vsyncpa [#allocation3 + $0x1], 0 }
   0x2   :  { %13 = vsyncpa [#allocation6], 0 }
   0x3   :  { %14 = vsyncpa [#allocation9], 0 }
   0x4   :  { %15 = vsyncpa [#allocation4], 0 }
   0x5   :  { %17 = vsyncpa [#allocation4 + $0x1], 0  ;;  %s1774_s18 = smov 0   ;;  %s1776_s19 = smov 0  }
   0x6   :  { %s1778_s20 = smov 0   ;;  %s1780_s21 = smov 0  }
   0x7 LB: > { %s175_s24 = sshll.u32 %s2001_s1, 4  ;;  %s1798_s25 = sadd.s32 4294967295, %s1736_s21   ;;  %s1736_s21 = sphi %s1780_s21, %s2017_s21   ;;  %s1732_s20 = sphi %s1778_s20, %s2016_s20   ;;  %s1728_s19 = sphi %s1776_s19, %s2015_s19   ;;  %s1724_s18 = sphi %s1774_s18, %s2014_s18   ;;  %s176_s24 = int_to_ptr.hbm [resolvable:$true] %s175_s24 }
   0x8   : > { %p1428_p0 = scmp.ge.s32.totalorder %s1736_s21, 1  ;;  %p44_p1 = scmp.eq.s32.totalorder %s1798_s25, 0 }
   0x9   : > { %p164_p2 = scmp.lt.s32.totalorder %s1736_s21, 3  ;;  %s1738_s27 = smov [#allocation5]  }
   0xa   : > { %s177_s28 = sshll.u32 %s1738_s27, 4  ;;  %s190_s6 = sshll.u32 %s2002_s2, 4  ;;  %s178_s28 = int_to_ptr.vmem [resolvable:$true] %s177_s28  ;;  %s191_s6 = int_to_ptr.hbm [resolvable:$true] %s190_s6 }
   0xb   : > { %p1803_p3 = pnand %p1428_p0, %p164_p2  ;;  %s201_s10 = sshll.u32 %s2003_s3, 4  ;;  %s202_s10 = int_to_ptr.hbm [resolvable:$true] %s201_s10 }
   0xc   : > { %s1739_s11 = smov [#allocation7]   ;;  %s1740_s13 = smov 2048  }
   0xd   : > { %p1477_p4 = pneg %p1803_p3  ;;  %s192_s12 = sshll.u32 %s1739_s11, 4  ;;  %s193_s12 = int_to_ptr.vmem [resolvable:$true] %s192_s12 }
   0xe   : > { %s1741_s14 = smov 128   ;;  %s1742_s15 = smov [#allocation8]  }
   0xf   : > { %p1815_p6 = pnand %p1477_p4, %p44_p1  ;;  %s203_s16 = sshll.u32 %s1742_s15, 4  ;;  %s204_s16 = int_to_ptr.vmem [resolvable:$true] %s203_s16 }
  0x10   : > { %s1743_s17 = smov 8   ;;  %s1427_s22 = sadd.s32 4294967294, %s1736_s21  }
  0x11   : > { %1480 = dma.hbm_to_vmem [thread:$0]  (!%p1815_p6), %s176_s24, 8192, %s178_s28, [#allocation6], %s1740_s13, %s1740_s13, %s1741_s14  }
  0x12   : > { %1483 = dma.hbm_to_vmem [thread:$0]  (!%p1815_p6), %s191_s6, 256, %s193_s12, [#allocation6]  }
  0x13   : > { %1486 = dma.hbm_to_vmem [thread:$0]  (!%p1815_p6), %s202_s10, 32768, %s204_s16, [#allocation9], %s1741_s14, %s1741_s14, %s1743_s17  }
  0x14   : > { %s1830_s23 = sadd.s32 1, %s1736_s21   ;;  %s30_s27 = sadd.s32 1, %s1732_s20 }
  0x15   : > { %s27_s24 = ssub.s32 %s1736_s21, %s1830_s23  ;;  %p37_p8 = scmp.ne.s32.totalorder %s1732_s20, %s1728_s19 }
  0x16   : > { %p28_p7 = scmp.eq.s32.totalorder %s27_s24, 0  ;;  %p38_p9 = scmp.eq.s32.totalorder %s1736_s21, 0 }
  0x17   : > { %p43_p10 = scmp.ne.s32.totalorder %s1728_s19, %s1724_s18  ;;  %p151_p13 = scmp.eq.s32.totalorder %s1798_s25, 1 }
  0x18   : > { %s1841_s28 = scalar_select %p28_p7, %s1732_s20, %s30_s27  }
  0x19   : > { %p1843_p11 = por %p38_p9, %p37_p8  ;;  %p1849_p12 = por %p44_p1, %p43_p10 }
  0x1a   : > { %p157_p0 = scmp.eq.s32.totalorder %s1427_s22, 1  ;;  %p1498_p2 = scmp.lt.s32.totalorder %s1736_s21, 2 }
  0x1b   : > { %s220_s6 = sand.u32 1, %s1732_s20   ;;  %p1856_p4 = por %p151_p13, %p37_p8 }
  0x1c   : > { %p1860_p6 = por %p157_p0, %p43_p10  ;;  %s1433_s9 = sshll.u32 %s220_s6, 3 }
  0x1d   : > { %s1434_s10 = sshll.u32 %s1736_s21, 3  ;;  %s224_s14 = scalar_lea.vmem [#allocation2], %s1433_s9 }
  0x1e   : > { %s228_s13 = scalar_lea.hbm %s2000_s0, %s1434_s10  ;;  %s232_s15 = sshll.u32 %s224_s14, 4  ;;  %s233_s15 = int_to_ptr.vmem [resolvable:$true] %s232_s15 }
  0x1f   : > { %s230_s16 = sshll.u32 %s228_s13, 4  ;;  %p1870_p7 = pnand %p1498_p2, %p1843_p11  ;;  %s231_s16 = int_to_ptr.hbm [resolvable:$true] %s230_s16 }
  0x20   : > { %s221_s22 = scalar_lea.sflag [#allocation3], %s220_s6  ;;  %s1632_s24 = sshra.s32 %s231_s16, 4  ;;  %s1633_s24 = int_to_ptr.hbm [resolvable:$true] %s1632_s24 }
  0x21   : > { %s1634_s27 = scalar_lea.hbm %s1633_s24, 8  ;;  %p1636_p9 = pneg %p1870_p7 }
  0x22   : > { %p1635_p8 = scmp.ne.s32.totalorder %s1633_s24, %s1634_s27  ;;  %s1639_s11 = scalar_lea.hbm %s2000_s0, 16 }
  0x23   : > { %p1640_p11 = scmp.lt.s32.totalorder %s1633_s24, %s2000_s0  ;;  %p1641_p0 = scmp.lt.s32.totalorder %s1639_s11, %s1634_s27 }
  0x24   : > { %p1637_p10 = pnand %p1636_p9, %p1635_p8 }
  0x25   : > { %p1642_p2 = por %p1641_p0, %p1640_p11 }
  0x26   : > { %p1638_p13 = pneg %p1637_p10 }
  0x28   : > { %p1643_p5 = pnand %p1642_p2, %p1638_p13 }
  0x2a   : > { %1646 = shalt.err (!%p1643_p5)
}
  0x2b   : > { %1490 = dma.hbm_to_vmem [thread:$0]  (!%p1870_p7), %s231_s16, 128, %s233_s15, %s221_s22  }
  0x2c   : > { %241 = sbr.rel (%p1803_p3) target bundleno = 407 (0x197), region = 40  ;;  %s1887_s6 = sand.u32 (!%p1803_p3), 1, %s1728_s19  }
  0x2d   : > { %s1436_s13 = sshll.u32 (!%p1803_p3), %s1887_s6, 3  ;;  %s244_s14 = scalar_lea.sflag (!%p1803_p3), [#allocation3], %s1887_s6 }
  0x2e   : > { %s1893_s24 = scalar_lea.vmem (!%p1803_p3), [#allocation2], %s1436_s13 }
  0x31   : > { %1707 = dma.done.wait (%p1849_p12), %s244_s14, 128  }
  0x32   : > { %1709 = vsyncadd (%p1849_p12), %s244_s14, 4294967168 }
  0x33   : > { %1711 = dma.done.wait (%p44_p1), [#allocation6], 8448  }
  0x34   : > { %1713 = vsyncadd (%p44_p1), [#allocation6], 4294958848 }
  0x35   : > { %1715 = dma.done.wait (%p44_p1), [#allocation9], 32768  }
  0x36   : > { %1717 = vsyncadd (%p44_p1), [#allocation9], 4294934528  ;;  %v339_v0 = vld [vmem:[#allocation5 + $0x180] sm:$0xff]  ;;  %v341_v1 = vld [vmem:[#allocation5 + $0x190] sm:$0xff]  ;;  %vm391_vm0 = vcmask 261120   ;;  %s1458_s15 = sshll.u32 %s1798_s25, 3 }
  0x37   : > { %v323_v2 = vld [vmem:[#allocation5 + $0x100] sm:$0xff]  ;;  %407 = vmatpush.msra.mxu0 %v339_v0  ;;  %447 = vmatpush.msra.mxu2 %v341_v1  ;;  %v340_v3 = vld [vmem:[#allocation5 + $0x188] sm:$0xff]  ;;  %v325_v4 = vld [vmem:[#allocation5 + $0x110] sm:$0xff]  ;;  %s1323_s22 = scalar_lea.hbm %s2005_s5, %s1458_s15  ;;  %s289_s27 = scalar_lea.vmem [#allocation10], %s1436_s13 }
  0x38   : > { %v342_v5 = vld [vmem:[#allocation5 + $0x198] sm:$0xff]  ;;  %427 = vmatpush.msra.mxu1 %v340_v3  ;;  %v307_v6 = vld [vmem:[#allocation5 + $0x80] sm:$0xff]  ;;  %v324_v7 = vld [vmem:[#allocation5 + $0x108] sm:$0xff]  ;;  %s1325_s9 = sshll.u32 %s289_s27, 4  ;;  %s1327_s10 = sshll.u32 %s1323_s22, 4  ;;  %s1326_s9 = int_to_ptr.vmem [resolvable:$true] %s1325_s9  ;;  %s1328_s10 = int_to_ptr.hbm [resolvable:$true] %s1327_s10 }
  0x39   : > { %467 = vmatpush.msra.mxu3 %v342_v5  ;;  %v309_v8 = vld [vmem:[#allocation5 + $0x90] sm:$0xff]  ;;  %408 = vmatpush.msra.mxu0 %v323_v2  ;;  %v326_v9 = vld [vmem:[#allocation5 + $0x118] sm:$0xff]  ;;  %v308_v10 = vld [vmem:[#allocation5 + $0x88] sm:$0xff]  ;;  %s1313_s11 = scalar_lea.sflag [#allocation4], %s1887_s6  ;;  %s1676_s25 = sshra.s32 %s1328_s10, 4  ;;  %s1677_s25 = int_to_ptr.hbm [resolvable:$true] %s1676_s25 }
  0x3a   : > { %448 = vmatpush.msra.mxu2 %v325_v4  ;;  %428 = vmatpush.msra.mxu1 %v324_v7  ;;  %v291_v11 = vld [vmem:[#allocation5] sm:$0xff]  ;;  %v293_v12 = vld [vmem:[#allocation5 + $0x10] sm:$0xff]  ;;  %v310_v13 = vld [vmem:[#allocation5 + $0x98] sm:$0xff]  ;;  %s1678_s12 = scalar_lea.hbm %s1677_s25, 8  ;;  %p1683_p12 = scmp.lt.s32.totalorder %s1677_s25, %s2005_s5 }
  0x3b   : > { %468 = vmatpush.msra.mxu3 %v326_v9  ;;  %409 = vmatpush.msra.mxu0 %v307_v6  ;;  %v1908_v14 = vld [vmem:[%s1893_s24] sm:$0xff]  ;;  %v292_v15 = vld [vmem:[#allocation5 + $0x8] sm:$0xff]  ;;  %v343_v18 = vld [vmem:[#allocation5 + $0x1a0] sm:$0xff]  ;;  %p1679_p1 = scmp.ne.s32.totalorder %s1677_s25, %s1678_s12  ;;  %s1682_s24 = scalar_lea.hbm %s2005_s5, 16 }
  0x3c   : > { %449 = vmatpush.msra.mxu2 %v309_v8  ;;  %429 = vmatpush.msra.mxu1 %v308_v10  ;;  %v294_v16 = vld [vmem:[#allocation5 + $0x18] sm:$0xff]  ;;  %v345_v17 = vld [vmem:[#allocation5 + $0x1b0] sm:$0xff]  ;;  %v327_v21 = vld [vmem:[#allocation5 + $0x120] sm:$0xff]  ;;  %p1684_p7 = scmp.lt.s32.totalorder %s1682_s24, %s1678_s12 }
  0x3d   : > { %469 = vmatpush.msra.mxu3 %v310_v13  ;;  %410 = vmatpush.msra.mxu0 %v291_v11  ;;  %v329_v19 = vld [vmem:[#allocation5 + $0x130] sm:$0xff]  ;;  %v346_v20 = vld [vmem:[#allocation5 + $0x1b8] sm:$0xff]  ;;  %v344_v22 = vld [vmem:[#allocation5 + $0x1a8] sm:$0xff]  ;;  %p1680_p3 = pnand %p1679_p1, %p1856_p4 }
  0x3e   : > { %450 = vmatpush.msra.mxu2 %v293_v12  ;;  %1441 = vmatmul.msk.f32.vlgmr.msra.gmra.mxu0 %vm391_vm0, %v1908_v14  ;;  %v313_v23 = vld [vmem:[#allocation5 + $0xb0] sm:$0xff]  ;;  %v330_v24 = vld [vmem:[#allocation5 + $0x138] sm:$0xff]  ;;  %v311_v25 = vld [vmem:[#allocation5 + $0xa0] sm:$0xff]  ;;  %p1685_p8 = por %p1684_p7, %p1683_p12 }
  0x3f   : > { %1443 = vmatmul.msk.f32.vlgmr.msra.gmra.mxu2 %vm391_vm0, %v1908_v14  ;;  %430 = vmatpush.msra.mxu1 %v292_v15  ;;  %v328_v26 = vld [vmem:[#allocation5 + $0x128] sm:$0xff]  ;;  %v297_v27 = vld [vmem:[#allocation5 + $0x30] sm:$0xff]  ;;  %v314_v28 = vld [vmem:[#allocation5 + $0xb8] sm:$0xff]  ;;  %p1681_p5 = pneg %p1680_p3 }
  0x40   : > { %470 = vmatpush.msra.mxu3 %v294_v16  ;;  %527 = vmatpush.msrb.mxu2 %v345_v17  ;;  %v295_v29 = vld [vmem:[#allocation5 + $0x20] sm:$0xff]  ;;  %v298_v30 = vld [vmem:[#allocation5 + $0x38] sm:$0xff]  ;;  %v312_v31 = vld [vmem:[#allocation5 + $0xa8] sm:$0xff] }
  0x41   : > { %1442 = vmatmul.msk.f32.vlgmr.msra.gmra.mxu1 %vm391_vm0, %v1908_v14  ;;  %1444 = vmatmul.msk.f32.vlgmr.msra.gmra.mxu3 %vm391_vm0, %v1908_v14  ;;  %v296_v32 = vld [vmem:[#allocation5 + $0x28] sm:$0xff]  ;;  %v347_v33 = vld [vmem:[#allocation5 + $0x1c0] sm:$0xff]  ;;  %v349_v34 = vld [vmem:[#allocation5 + $0x1d0] sm:$0xff]  ;;  %p1686_p9 = pnand %p1685_p8, %p1681_p5 }
  0x42   : > { %487 = vmatpush.msrb.mxu0 %v343_v18  ;;  %528 = vmatpush.msrb.mxu2 %v329_v19  ;;  %v331_v35 = vld [vmem:[#allocation5 + $0x140] sm:$0xff]  ;;  %v348_v36 = vld [vmem:[#allocation5 + $0x1c8] sm:$0xff]  ;;  %v333_v37 = vld [vmem:[#allocation5 + $0x150] sm:$0xff] }
  0x43   : > { %547 = vmatpush.msrb.mxu3 %v346_v20  ;;  %507 = vmatpush.msrb.mxu1 %v344_v22  ;;  %v350_v38 = vld [vmem:[#allocation5 + $0x1d8] sm:$0xff]  ;;  %v315_v39 = vld [vmem:[#allocation5 + $0xc0] sm:$0xff]  ;;  %v332_v40 = vld [vmem:[#allocation5 + $0x148] sm:$0xff] }
  0x44   : > { %488 = vmatpush.msrb.mxu0 %v327_v21  ;;  %529 = vmatpush.msrb.mxu2 %v313_v23  ;;  %v317_v41 = vld [vmem:[#allocation5 + $0xd0] sm:$0xff]  ;;  %v334_v42 = vld [vmem:[#allocation5 + $0x158] sm:$0xff]  ;;  %v299_v43 = vld [vmem:[#allocation5 + $0x40] sm:$0xff] }
  0x45   : > { %548 = vmatpush.msrb.mxu3 %v330_v24  ;;  %508 = vmatpush.msrb.mxu1 %v328_v26  ;;  %v316_v44 = vld [vmem:[#allocation5 + $0xc8] sm:$0xff]  ;;  %v301_v45 = vld [vmem:[#allocation5 + $0x50] sm:$0xff]  ;;  %v318_v46 = vld [vmem:[#allocation5 + $0xd8] sm:$0xff] }
  0x46   : > { %489 = vmatpush.msrb.mxu0 %v311_v25  ;;  %530 = vmatpush.msrb.mxu2 %v297_v27  ;;  %v300_v47 = vld [vmem:[#allocation5 + $0x48] sm:$0xff]  ;;  %v302_v48 = vld [vmem:[#allocation5 + $0x58] sm:$0xff]  ;;  %v353_v49 = vld [vmem:[#allocation5 + $0x1f0] sm:$0xff] }
  0x47   : > { %549 = vmatpush.msrb.mxu3 %v314_v28  ;;  %1447 = vmatmul.msk.f32.vlgmr.msrb.gmra.mxu2 %vm391_vm0, %v1908_v14  ;;  %v351_v50 = vld [vmem:[#allocation5 + $0x1e0] sm:$0xff]  ;;  %v354_v51 = vld [vmem:[#allocation5 + $0x1f8] sm:$0xff]  ;;  %v352_v52 = vld [vmem:[#allocation5 + $0x1e8] sm:$0xff] }
  0x48   : > { %490 = vmatpush.msrb.mxu0 %v295_v29  ;;  %509 = vmatpush.msrb.mxu1 %v312_v31  ;;  %v337_v53 = vld [vmem:[#allocation5 + $0x170] sm:$0xff]  ;;  %v335_v54 = vld [vmem:[#allocation5 + $0x160] sm:$0xff]  ;;  %v338_v55 = vld [vmem:[#allocation5 + $0x178] sm:$0xff] }
  0x49   : > { %550 = vmatpush.msrb.mxu3 %v298_v30  ;;  %1445 = vmatmul.msk.f32.vlgmr.msrb.gmra.mxu0 %vm391_vm0, %v1908_v14  ;;  %v336_v56 = vld [vmem:[#allocation5 + $0x168] sm:$0xff]  ;;  %v321_v57 = vld [vmem:[#allocation5 + $0xf0] sm:$0xff]  ;;  %v319_v58 = vld [vmem:[#allocation5 + $0xe0] sm:$0xff] }
  0x4a   : > { %1448 = vmatmul.msk.f32.vlgmr.msrb.gmra.mxu3 %vm391_vm0, %v1908_v14  ;;  %510 = vmatpush.msrb.mxu1 %v296_v32  ;;  %v322_v59 = vld [vmem:[#allocation5 + $0xf8] sm:$0xff]  ;;  %v320_v60 = vld [vmem:[#allocation5 + $0xe8] sm:$0xff]  ;;  %v305_v61 = vld [vmem:[#allocation5 + $0x70] sm:$0xff] }
  0x4b   : > { %567 = vmatpush.msra.mxu0 %v347_v33  ;;  %1446 = vmatmul.msk.f32.vlgmr.msrb.gmra.mxu1 %vm391_vm0, %v1908_v14  ;;  %v303_v62 = vld [vmem:[#allocation5 + $0x60] sm:$0xff]  ;;  %v306_v63 = vld [vmem:[#allocation5 + $0x78] sm:$0xff]  ;;  %v304_v0 = vld [vmem:[#allocation5 + $0x68] sm:$0xff] }
  0x4c   : > { %607 = vmatpush.msra.mxu2 %v349_v34  ;;  %587 = vmatpush.msra.mxu1 %v348_v36  ;;  %v746_v1 = vld [vmem:[#allocation8 + $0x78] sm:$0xff]  ;;  %v745_v5 = vld [vmem:[#allocation8 + $0x70] sm:$0xff]  ;;  %v744_v9 = vld [vmem:[#allocation8 + $0x68] sm:$0xff] }
  0x4d   : > { %568 = vmatpush.msra.mxu0 %v331_v35  ;;  %627 = vmatpush.msra.mxu3 %v350_v38  ;;  %v762_v2 = vld [vmem:[#allocation8 + $0xf8] sm:$0xff]  ;;  %v761_v6 = vld [vmem:[#allocation8 + $0xf0] sm:$0xff]  ;;  %v760_v10 = vld [vmem:[#allocation8 + $0xe8] sm:$0xff] }
  0x4e   : > { %608 = vmatpush.msra.mxu2 %v333_v37  ;;  %588 = vmatpush.msra.mxu1 %v332_v40  ;;  %v778_v3 = vld [vmem:[#allocation8 + $0x178] sm:$0xff]  ;;  %v777_v7 = vld [vmem:[#allocation8 + $0x170] sm:$0xff]  ;;  %v776_v11 = vld [vmem:[#allocation8 + $0x168] sm:$0xff] }
  0x4f   : > { %569 = vmatpush.msra.mxu0 %v315_v39  ;;  %628 = vmatpush.msra.mxu3 %v334_v42  ;;  %v794_v4 = vld [vmem:[#allocation8 + $0x1f8] sm:$0xff]  ;;  %v793_v8 = vld [vmem:[#allocation8 + $0x1f0] sm:$0xff]  ;;  %v792_v12 = vld [vmem:[#allocation8 + $0x1e8] sm:$0xff] }
  0x50   : > { %609 = vmatpush.msra.mxu2 %v317_v41  ;;  %589 = vmatpush.msra.mxu1 %v316_v44  ;;  %v743_v13 = vld [vmem:[#allocation8 + $0x60] sm:$0xff]  ;;  %v742_v17 = vld [vmem:[#allocation8 + $0x58] sm:$0xff]  ;;  %v741_v21 = vld [vmem:[#allocation8 + $0x50] sm:$0xff] }
  0x51   : > { %570 = vmatpush.msra.mxu0 %v299_v43  ;;  %629 = vmatpush.msra.mxu3 %v318_v46  ;;  %v759_v15 = vld [vmem:[#allocation8 + $0xe0] sm:$0xff]  ;;  %v758_v18 = vld [vmem:[#allocation8 + $0xd8] sm:$0xff]  ;;  %v757_v22 = vld [vmem:[#allocation8 + $0xd0] sm:$0xff] }
  0x52   : > { %610 = vmatpush.msra.mxu2 %v301_v45  ;;  %1449 = vmatmul.msk.f32.vlgmr.msra.gmra.mxu0 %vm391_vm0, %v1908_v14  ;;  %v791_v16 = vld [vmem:[#allocation8 + $0x1e0] sm:$0xff]  ;;  %v774_v19 = vld [vmem:[#allocation8 + $0x158] sm:$0xff]  ;;  %v773_v23 = vld [vmem:[#allocation8 + $0x150] sm:$0xff] }
  0x53   : > { %1451 = vmatmul.msk.f32.vlgmr.msra.gmra.mxu2 %vm391_vm0, %v1908_v14  ;;  %590 = vmatpush.msra.mxu1 %v300_v47  ;;  %v790_v20 = vld [vmem:[#allocation8 + $0x1d8] sm:$0xff]  ;;  %v789_v24 = vld [vmem:[#allocation8 + $0x1d0] sm:$0xff]  ;;  %v740_v25 = vld [vmem:[#allocation8 + $0x48] sm:$0xff] }
  0x54   : > { %630 = vmatpush.msra.mxu3 %v302_v48  ;;  %1450 = vmatmul.msk.f32.vlgmr.msra.gmra.mxu1 %vm391_vm0, %v1908_v14  ;;  %v756_v26 = vld [vmem:[#allocation8 + $0xc8] sm:$0xff]  ;;  %v739_v29 = vld [vmem:[#allocation8 + $0x40] sm:$0xff]  ;;  %v738_v33 = vld [vmem:[#allocation8 + $0x38] sm:$0xff] }
  0x55   : > { %1452 = vmatmul.msk.f32.vlgmr.msra.gmra.mxu3 %vm391_vm0, %v1908_v14  ;;  %687 = vmatpush.msrb.mxu2 %v353_v49  ;;  %v772_v27 = vld [vmem:[#allocation8 + $0x148] sm:$0xff]  ;;  %v755_v30 = vld [vmem:[#allocation8 + $0xc0] sm:$0xff]  ;;  %v754_v34 = vld [vmem:[#allocation8 + $0xb8] sm:$0xff] }
  0x56   : > { %647 = vmatpush.msrb.mxu0 %v351_v50  ;;  %707 = vmatpush.msrb.mxu3 %v354_v51  ;;  %v788_v28 = vld [vmem:[#allocation8 + $0x1c8] sm:$0xff]  ;;  %v771_v31 = vld [vmem:[#allocation8 + $0x140] sm:$0xff]  ;;  %v770_v35 = vld [vmem:[#allocation8 + $0x138] sm:$0xff] }
  0x57   : > { %667 = vmatpush.msrb.mxu1 %v352_v52  ;;  %688 = vmatpush.msrb.mxu2 %v337_v53  ;;  %v787_v32 = vld [vmem:[#allocation8 + $0x1c0] sm:$0xff]  ;;  %v786_v36 = vld [vmem:[#allocation8 + $0x1b8] sm:$0xff]  ;;  %v737_v37 = vld [vmem:[#allocation8 + $0x30] sm:$0xff] }
  0x58   : > { %648 = vmatpush.msrb.mxu0 %v335_v54  ;;  %708 = vmatpush.msrb.mxu3 %v338_v55  ;;  %v753_v38 = vld [vmem:[#allocation8 + $0xb0] sm:$0xff]  ;;  %v736_v41 = vld [vmem:[#allocation8 + $0x28] sm:$0xff]  ;;  %v735_v45 = vld [vmem:[#allocation8 + $0x20] sm:$0xff] }
  0x59   : > { %668 = vmatpush.msrb.mxu1 %v336_v56  ;;  %689 = vmatpush.msrb.mxu2 %v321_v57  ;;  %v769_v39 = vld [vmem:[#allocation8 + $0x130] sm:$0xff]  ;;  %v752_v42 = vld [vmem:[#allocation8 + $0xa8] sm:$0xff]  ;;  %v751_v46 = vld [vmem:[#allocation8 + $0xa0] sm:$0xff] }
  0x5a   : > { %649 = vmatpush.msrb.mxu0 %v319_v58  ;;  %709 = vmatpush.msrb.mxu3 %v322_v59  ;;  %v785_v40 = vld [vmem:[#allocation8 + $0x1b0] sm:$0xff]  ;;  %v768_v43 = vld [vmem:[#allocation8 + $0x128] sm:$0xff]  ;;  %v767_v47 = vld [vmem:[#allocation8 + $0x120] sm:$0xff] }
  0x5b   : > { %669 = vmatpush.msrb.mxu1 %v320_v60  ;;  %690 = vmatpush.msrb.mxu2 %v305_v61  ;;  %v784_v44 = vld [vmem:[#allocation8 + $0x1a8] sm:$0xff]  ;;  %v783_v48 = vld [vmem:[#allocation8 + $0x1a0] sm:$0xff]  ;;  %v734_v49 = vld [vmem:[#allocation8 + $0x18] sm:$0xff] }
  0x5c   : > { %650 = vmatpush.msrb.mxu0 %v303_v62  ;;  %1455 = vmatmul.msk.f32.vlgmr.msrb.gmra.mxu2 %vm391_vm0, %v1908_v14  ;;  %v750_v50 = vld [vmem:[#allocation8 + $0x98] sm:$0xff]  ;;  %v733_v53 = vld [vmem:[#allocation8 + $0x10] sm:$0xff]  ;;  %v732_v57 = vld [vmem:[#allocation8 + $0x8] sm:$0xff] }
  0x5d   : > { %1453 = vmatmul.msk.f32.vlgmr.msrb.gmra.mxu0 %vm391_vm0, %v1908_v14  ;;  %710 = vmatpush.msrb.mxu3 %v306_v63  ;;  %v766_v51 = vld [vmem:[#allocation8 + $0x118] sm:$0xff]  ;;  %v749_v54 = vld [vmem:[#allocation8 + $0x90] sm:$0xff]  ;;  %v748_v58 = vld [vmem:[#allocation8 + $0x88] sm:$0xff] }
  0x5e   : > { %670 = vmatpush.msrb.mxu1 %v304_v0  ;;  %1456 = vmatmul.msk.f32.vlgmr.msrb.gmra.mxu3 %vm391_vm0, %v1908_v14  ;;  %v782_v52 = vld [vmem:[#allocation8 + $0x198] sm:$0xff]  ;;  %v765_v55 = vld [vmem:[#allocation8 + $0x110] sm:$0xff]  ;;  %v764_v59 = vld [vmem:[#allocation8 + $0x108] sm:$0xff] }
  0x5f   : > { %1454 = vmatmul.msk.f32.vlgmr.msrb.gmra.mxu1 %vm391_vm0, %v1908_v14  ;;  %991 = vmatpush.msra.mxu0 %v746_v1  ;;  %v775_v14 = vld [vmem:[#allocation8 + $0x160] sm:$0xff]  ;;  %v781_v56 = vld [vmem:[#allocation8 + $0x190] sm:$0xff]  ;;  %v780_v60 = vld [vmem:[#allocation8 + $0x188] sm:$0xff] }
  0x60   : > { %1011 = vmatpush.msra.mxu1 %v762_v2  ;;  %1031 = vmatpush.msra.mxu2 %v778_v3  ;;  %v731_v61 = vld [vmem:[#allocation8] sm:$0xff]  ;;  %v810_v63 = vld [vmem:[#allocation8 + $0x278] sm:$0xff]  ;;  %v809_v3 = vld [vmem:[#allocation8 + $0x270] sm:$0xff] }
  0x61   : > { %1051 = vmatpush.msra.mxu3 %v794_v4  ;;  %992 = vmatpush.msra.mxu0 %v745_v5  ;;  %v747_v62 = vld [vmem:[#allocation8 + $0x80] sm:$0xff]  ;;  %v826_v0 = vld [vmem:[#allocation8 + $0x2f8] sm:$0xff]  ;;  %v825_v4 = vld [vmem:[#allocation8 + $0x2f0] sm:$0xff] }
  0x62   : > { %1012 = vmatpush.msra.mxu1 %v761_v6  ;;  %1032 = vmatpush.msra.mxu2 %v777_v7  ;;  %v763_v1 = vld [vmem:[#allocation8 + $0x100] sm:$0xff]  ;;  %v842_v5 = vld [vmem:[#allocation8 + $0x378] sm:$0xff]  ;;  %v808_v7 = vld [vmem:[#allocation8 + $0x268] sm:$0xff] }
  0x63   : > { %1052 = vmatpush.msra.mxu3 %v793_v8  ;;  %993 = vmatpush.msra.mxu0 %v744_v9  ;;  %v779_v2 = vld [vmem:[#allocation8 + $0x180] sm:$0xff]  ;;  %v858_v6 = vld [vmem:[#allocation8 + $0x3f8] sm:$0xff]  ;;  %v824_v8 = vld [vmem:[#allocation8 + $0x2e8] sm:$0xff] }
  0x64   : > { %1013 = vmatpush.msra.mxu1 %v760_v10  ;;  %1033 = vmatpush.msra.mxu2 %v776_v11  ;;  %v841_v9 = vld [vmem:[#allocation8 + $0x370] sm:$0xff]  ;;  %v807_v11 = vld [vmem:[#allocation8 + $0x260] sm:$0xff] }
  0x65   : > { %1053 = vmatpush.msra.mxu3 %v792_v12  ;;  %994 = vmatpush.msra.mxu0 %v743_v13  ;;  %v857_v10 = vld [vmem:[#allocation8 + $0x3f0] sm:$0xff]  ;;  %v823_v12 = vld [vmem:[#allocation8 + $0x2e0] sm:$0xff]  ;;  %v840_v13 = vld [vmem:[#allocation8 + $0x368] sm:$0xff] }
  0x66   : > { %1014 = vmatpush.msra.mxu1 %v759_v15  ;;  %1034 = vmatpush.msra.mxu2 %v775_v14  ;;  %v856_v15 = vld [vmem:[#allocation8 + $0x3e8] sm:$0xff]  ;;  %v806_v14 = vld [vmem:[#allocation8 + $0x258] sm:$0xff] }
  0x67   : > { %1054 = vmatpush.msra.mxu3 %v791_v16  ;;  %995 = vmatpush.msra.mxu0 %v742_v17  ;;  %v822_v16 = vld [vmem:[#allocation8 + $0x2d8] sm:$0xff]  ;;  %v839_v17 = vld [vmem:[#allocation8 + $0x360] sm:$0xff] }
  0x68   : > { %1015 = vmatpush.msra.mxu1 %v758_v18  ;;  %1035 = vmatpush.msra.mxu2 %v774_v19  ;;  %v855_v18 = vld [vmem:[#allocation8 + $0x3e0] sm:$0xff]  ;;  %v805_v19 = vld [vmem:[#allocation8 + $0x250] sm:$0xff] }
  0x69   : > { %1055 = vmatpush.msra.mxu3 %v790_v20  ;;  %996 = vmatpush.msra.mxu0 %v741_v21  ;;  %v821_v20 = vld [vmem:[#allocation8 + $0x2d0] sm:$0xff]  ;;  %v838_v21 = vld [vmem:[#allocation8 + $0x358] sm:$0xff] }
  0x6a   : > { %1016 = vmatpush.msra.mxu1 %v757_v22  ;;  %1036 = vmatpush.msra.mxu2 %v773_v23  ;;  %v854_v22 = vld [vmem:[#allocation8 + $0x3d8] sm:$0xff]  ;;  %v804_v23 = vld [vmem:[#allocation8 + $0x248] sm:$0xff] }
  0x6b   : > { %1056 = vmatpush.msra.mxu3 %v789_v24  ;;  %997 = vmatpush.msra.mxu0 %v740_v25  ;;  %v820_v24 = vld [vmem:[#allocation8 + $0x2c8] sm:$0xff]  ;;  %v837_v25 = vld [vmem:[#allocation8 + $0x350] sm:$0xff] }
  0x6c   : > { %1017 = vmatpush.msra.mxu1 %v756_v26  ;;  %1037 = vmatpush.msra.mxu2 %v772_v27  ;;  %v853_v26 = vld [vmem:[#allocation8 + $0x3d0] sm:$0xff]  ;;  %v803_v27 = vld [vmem:[#allocation8 + $0x240] sm:$0xff] }
  0x6d   : > { %1057 = vmatpush.msra.mxu3 %v788_v28  ;;  %998 = vmatpush.msra.mxu0 %v739_v29  ;;  %v819_v28 = vld [vmem:[#allocation8 + $0x2c0] sm:$0xff]  ;;  %v836_v29 = vld [vmem:[#allocation8 + $0x348] sm:$0xff] }
  0x6e   : > { %1018 = vmatpush.msra.mxu1 %v755_v30  ;;  %1038 = vmatpush.msra.mxu2 %v771_v31  ;;  %v852_v30 = vld [vmem:[#allocation8 + $0x3c8] sm:$0xff]  ;;  %v802_v31 = vld [vmem:[#allocation8 + $0x238] sm:$0xff] }
  0x6f   : > { %1058 = vmatpush.msra.mxu3 %v787_v32  ;;  %999 = vmatpush.msra.mxu0 %v738_v33  ;;  %v818_v32 = vld [vmem:[#allocation8 + $0x2b8] sm:$0xff]  ;;  %v835_v33 = vld [vmem:[#allocation8 + $0x340] sm:$0xff] }
  0x70   : > { %1019 = vmatpush.msra.mxu1 %v754_v34  ;;  %1039 = vmatpush.msra.mxu2 %v770_v35  ;;  %v851_v34 = vld [vmem:[#allocation8 + $0x3c0] sm:$0xff]  ;;  %v801_v35 = vld [vmem:[#allocation8 + $0x230] sm:$0xff] }
  0x71   : > { %1059 = vmatpush.msra.mxu3 %v786_v36  ;;  %1000 = vmatpush.msra.mxu0 %v737_v37  ;;  %v817_v36 = vld [vmem:[#allocation8 + $0x2b0] sm:$0xff]  ;;  %v834_v37 = vld [vmem:[#allocation8 + $0x338] sm:$0xff] }
  0x72   : > { %1020 = vmatpush.msra.mxu1 %v753_v38  ;;  %1040 = vmatpush.msra.mxu2 %v769_v39  ;;  %v850_v38 = vld [vmem:[#allocation8 + $0x3b8] sm:$0xff]  ;;  %v800_v39 = vld [vmem:[#allocation8 + $0x228] sm:$0xff] }
  0x73   : > { %1060 = vmatpush.msra.mxu3 %v785_v40  ;;  %1001 = vmatpush.msra.mxu0 %v736_v41  ;;  %v816_v40 = vld [vmem:[#allocation8 + $0x2a8] sm:$0xff]  ;;  %v833_v41 = vld [vmem:[#allocation8 + $0x330] sm:$0xff] }
  0x74   : > { %1021 = vmatpush.msra.mxu1 %v752_v42  ;;  %1041 = vmatpush.msra.mxu2 %v768_v43  ;;  %v799_v42 = vld [vmem:[#allocation8 + $0x220] sm:$0xff] }
  0x75   : > { %1061 = vmatpush.msra.mxu3 %v784_v44  ;;  %1002 = vmatpush.msra.mxu0 %v735_v45  ;;  %v815_v43 = vld [vmem:[#allocation8 + $0x2a0] sm:$0xff]  ;;  %v798_v44 = vld [vmem:[#allocation8 + $0x218] sm:$0xff]  ;;  %v797_v45 = vld [vmem:[#allocation8 + $0x210] sm:$0xff] }
  0x76   : > { %1022 = vmatpush.msra.mxu1 %v751_v46  ;;  %1042 = vmatpush.msra.mxu2 %v767_v47  ;;  %v814_v46 = vld [vmem:[#allocation8 + $0x298] sm:$0xff]  ;;  %v832_v47 = vld [vmem:[#allocation8 + $0x328] sm:$0xff] }
  0x77   : > { %1062 = vmatpush.msra.mxu3 %v783_v48  ;;  %1003 = vmatpush.msra.mxu0 %v734_v49  ;;  %v849_v48 = vld [vmem:[#allocation8 + $0x3b0] sm:$0xff]  ;;  %v796_v49 = vld [vmem:[#allocation8 + $0x208] sm:$0xff] }
  0x78   : > { %1023 = vmatpush.msra.mxu1 %v750_v50  ;;  %1043 = vmatpush.msra.mxu2 %v766_v51  ;;  %v813_v50 = vld [vmem:[#allocation8 + $0x290] sm:$0xff]  ;;  %v831_v51 = vld [vmem:[#allocation8 + $0x320] sm:$0xff] }
  0x79   : > { %1063 = vmatpush.msra.mxu3 %v782_v52  ;;  %1004 = vmatpush.msra.mxu0 %v733_v53  ;;  %v848_v52 = vld [vmem:[#allocation8 + $0x3a8] sm:$0xff]  ;;  %v795_v53 = vld [vmem:[#allocation8 + $0x200] sm:$0xff] }
  0x7a   : > { %1024 = vmatpush.msra.mxu1 %v749_v54  ;;  %1044 = vmatpush.msra.mxu2 %v765_v55  ;;  %v812_v54 = vld [vmem:[#allocation8 + $0x288] sm:$0xff]  ;;  %v830_v55 = vld [vmem:[#allocation8 + $0x318] sm:$0xff] }
  0x7b   : > { %1064 = vmatpush.msra.mxu3 %v781_v56  ;;  %1005 = vmatpush.msra.mxu0 %v732_v57  ;;  %v847_v56 = vld [vmem:[#allocation8 + $0x3a0] sm:$0xff] }
  0x7c   : > { %1025 = vmatpush.msra.mxu1 %v748_v58  ;;  %1045 = vmatpush.msra.mxu2 %v764_v59  ;;  %v811_v57 = vld [vmem:[#allocation8 + $0x280] sm:$0xff]  ;;  %v829_v58 = vld [vmem:[#allocation8 + $0x310] sm:$0xff]  ;;  %v846_v59 = vld [vmem:[#allocation8 + $0x398] sm:$0xff] }
  0x7d   : > { %1065 = vmatpush.msra.mxu3 %v780_v60  ;;  %1006 = vmatpush.msra.mxu0 %v731_v61  ;;  %v828_v60 = vld [vmem:[#allocation8 + $0x308] sm:$0xff]  ;;  %v845_v61 = vld [vmem:[#allocation8 + $0x390] sm:$0xff] }
  0x7e   : > { %1026 = vmatpush.msra.mxu1 %v747_v62  ;;  %1046 = vmatpush.msra.mxu2 %v763_v1  ;;  %v827_v62 = vld [vmem:[#allocation8 + $0x300] sm:$0xff]  ;;  %v1942_v1 = vld [vmem:[#allocation7] sm:$0xff] }
  0x7f   : > { %1071 = vmatpush.msrb.mxu0 %v810_v63  ;;  %1066 = vmatpush.msra.mxu3 %v779_v2  ;;  %v844_v63 = vld [vmem:[#allocation8 + $0x388] sm:$0xff]  ;;  %v359_v2 = vperm.slane %v1942_v1, 0 }
  0x80   : > { %1091 = vmatpush.msrb.mxu1 %v826_v0  ;;  %1111 = vmatpush.msrb.mxu2 %v842_v5  ;;  %v843_v0 = vld [vmem:[#allocation8 + $0x380] sm:$0xff] }
  0x81   : > { %1072 = vmatpush.msrb.mxu0 %v809_v3  ;;  %1131 = vmatpush.msrb.mxu3 %v858_v6  ;;  %v360_v3 = vperm.slane %v1942_v1, 1 }
  0x82   : > { %1092 = vmatpush.msrb.mxu1 %v825_v4  ;;  %1112 = vmatpush.msrb.mxu2 %v841_v9  ;;  %v874_v9 = vld [vmem:[#allocation8 + $0x478] sm:$0xff] }
  0x83   : > { %1073 = vmatpush.msrb.mxu0 %v808_v7  ;;  %1132 = vmatpush.msrb.mxu3 %v857_v10  ;;  %v361_v10 = vperm.slane %v1942_v1, 2 }
  0x84   : > { %1093 = vmatpush.msrb.mxu1 %v824_v8  ;;  %1113 = vmatpush.msrb.mxu2 %v840_v13  ;;  %v890_v13 = vld [vmem:[#allocation8 + $0x4f8] sm:$0xff] }
  0x85   : > { %1074 = vmatpush.msrb.mxu0 %v807_v11  ;;  %1133 = vmatpush.msrb.mxu3 %v856_v15 }
  0x86   : > { %1094 = vmatpush.msrb.mxu1 %v823_v12  ;;  %1114 = vmatpush.msrb.mxu2 %v839_v17  ;;  %v873_v12 = vld [vmem:[#allocation8 + $0x470] sm:$0xff]  ;;  %v872_v17 = vld [vmem:[#allocation8 + $0x468] sm:$0xff] }
  0x87   : > { %1075 = vmatpush.msrb.mxu0 %v806_v14  ;;  %1134 = vmatpush.msrb.mxu3 %v855_v18  ;;  %v362_v14 = vperm.slane %v1942_v1, 3  ;;  %v889_v18 = vld [vmem:[#allocation8 + $0x4f0] sm:$0xff] }
  0x88   : > { %1095 = vmatpush.msrb.mxu1 %v822_v16  ;;  %1115 = vmatpush.msrb.mxu2 %v838_v21  ;;  %v871_v21 = vld [vmem:[#allocation8 + $0x460] sm:$0xff] }
  0x89   : > { %1076 = vmatpush.msrb.mxu0 %v805_v19  ;;  %1135 = vmatpush.msrb.mxu3 %v854_v22  ;;  %v888_v22 = vld [vmem:[#allocation8 + $0x4e8] sm:$0xff] }
  0x8a   : > { %1096 = vmatpush.msrb.mxu1 %v821_v20  ;;  %1116 = vmatpush.msrb.mxu2 %v837_v25  ;;  %v870_v25 = vld [vmem:[#allocation8 + $0x458] sm:$0xff] }
  0x8b   : > { %1077 = vmatpush.msrb.mxu0 %v804_v23  ;;  %1136 = vmatpush.msrb.mxu3 %v853_v26  ;;  %v363_v26 = vperm.slane %v1942_v1, 4 }
  0x8c   : > { %1097 = vmatpush.msrb.mxu1 %v820_v24  ;;  %1117 = vmatpush.msrb.mxu2 %v836_v29  ;;  %v906_v24 = vld [vmem:[#allocation8 + $0x578] sm:$0xff]  ;;  %v905_v29 = vld [vmem:[#allocation8 + $0x570] sm:$0xff] }
  0x8d   : > { %1078 = vmatpush.msrb.mxu0 %v803_v27  ;;  %1137 = vmatpush.msrb.mxu3 %v852_v30  ;;  %v365_v30 = vperm.slane %v1942_v1, 6 }
  0x8e   : > { %1098 = vmatpush.msrb.mxu1 %v819_v28  ;;  %1118 = vmatpush.msrb.mxu2 %v835_v33  ;;  %v887_v28 = vld [vmem:[#allocation8 + $0x4e0] sm:$0xff]  ;;  %v869_v33 = vld [vmem:[#allocation8 + $0x450] sm:$0xff] }
  0x8f   : > { %1079 = vmatpush.msrb.mxu0 %v802_v31  ;;  %1138 = vmatpush.msrb.mxu3 %v851_v34  ;;  %v886_v34 = vld [vmem:[#allocation8 + $0x4d8] sm:$0xff] }
  0x90   : > { %1099 = vmatpush.msrb.mxu1 %v818_v32  ;;  %1119 = vmatpush.msrb.mxu2 %v834_v37  ;;  %v922_v32 = vld [vmem:[#allocation8 + $0x5f8] sm:$0xff]  ;;  %v364_v37 = vperm.slane %v1942_v1, 5 }
  0x91   : > { %1080 = vmatpush.msrb.mxu0 %v801_v35  ;;  %1139 = vmatpush.msrb.mxu3 %v850_v38  ;;  %v904_v35 = vld [vmem:[#allocation8 + $0x568] sm:$0xff] }
  0x92   : > { %1100 = vmatpush.msrb.mxu1 %v817_v36  ;;  %1120 = vmatpush.msrb.mxu2 %v833_v41  ;;  %v366_v36 = vperm.slane %v1942_v1, 7  ;;  %v868_v41 = vld [vmem:[#allocation8 + $0x448] sm:$0xff]  ;;  %v917_v1 = vld [vmem:[#allocation8 + $0x5d0] sm:$0xff] }
  0x93   : > { %1081 = vmatpush.msrb.mxu0 %v800_v39  ;;  %1140 = vmatpush.msrb.mxu3 %v849_v48  ;;  %v921_v39 = vld [vmem:[#allocation8 + $0x5f0] sm:$0xff] }
  0x94   : > { %1101 = vmatpush.msrb.mxu1 %v816_v40  ;;  %1121 = vmatpush.msrb.mxu2 %v832_v47  ;;  %v920_v47 = vld [vmem:[#allocation8 + $0x5e8] sm:$0xff] }
  0x95   : > { %1082 = vmatpush.msrb.mxu0 %v799_v42  ;;  %1141 = vmatpush.msrb.mxu3 %v848_v52  ;;  %v884_v52 = vld [vmem:[#allocation8 + $0x4c8] sm:$0xff] }
  0x96   : > { %1102 = vmatpush.msrb.mxu1 %v815_v43  ;;  %1122 = vmatpush.msrb.mxu2 %v831_v51  ;;  %v867_v51 = vld [vmem:[#allocation8 + $0x440] sm:$0xff] }
  0x97   : > { %1083 = vmatpush.msrb.mxu0 %v798_v44  ;;  %1142 = vmatpush.msrb.mxu3 %v847_v56  ;;  %v885_v44 = vld [vmem:[#allocation8 + $0x4d0] sm:$0xff] }
  0x98   : > { %1103 = vmatpush.msrb.mxu1 %v814_v46  ;;  %1123 = vmatpush.msrb.mxu2 %v830_v55  ;;  %v919_v55 = vld [vmem:[#allocation8 + $0x5e0] sm:$0xff] }
  0x99   : > { %1084 = vmatpush.msrb.mxu0 %v797_v45  ;;  %1143 = vmatpush.msrb.mxu3 %v846_v59  ;;  %v903_v45 = vld [vmem:[#allocation8 + $0x560] sm:$0xff] }
  0x9a   : > { %1104 = vmatpush.msrb.mxu1 %v813_v50  ;;  %1124 = vmatpush.msrb.mxu2 %v829_v58  ;;  %v883_v58 = vld [vmem:[#allocation8 + $0x4c0] sm:$0xff] }
  0x9b   : > { %1085 = vmatpush.msrb.mxu0 %v796_v49  ;;  %1144 = vmatpush.msrb.mxu3 %v845_v61  ;;  %v918_v61 = vld [vmem:[#allocation8 + $0x5d8] sm:$0xff] }
  0x9c   : > { %1105 = vmatpush.msrb.mxu1 %v812_v54  ;;  %1125 = vmatpush.msrb.mxu2 %v828_v60  ;;  %v902_v54 = vld [vmem:[#allocation8 + $0x558] sm:$0xff]  ;;  %v901_v60 = vld [vmem:[#allocation8 + $0x550] sm:$0xff] }
  0x9d   : > { %1086 = vmatpush.msrb.mxu0 %v795_v53  ;;  %1145 = vmatpush.msrb.mxu3 %v844_v63  ;;  %v882_v63 = vld [vmem:[#allocation8 + $0x4b8] sm:$0xff] }
  0x9e   : > { %1106 = vmatpush.msrb.mxu1 %v811_v57  ;;  %1126 = vmatpush.msrb.mxu2 %v827_v62  ;;  %v866_v57 = vld [vmem:[#allocation8 + $0x438] sm:$0xff]  ;;  %v865_v62 = vld [vmem:[#allocation8 + $0x430] sm:$0xff] }
  0x9f   : > { %1146 = vmatpush.msrb.mxu3 %v843_v0  ;;  %v900_v0 = vld [vmem:[#allocation8 + $0x548] sm:$0xff] }
  0xbb   : > { %v412_v4 = vpop.f32.mrf.mxu0 }
  0xbc   : > { %v413_v5 = vadd.f32 %v412_v4, %v359_v2  ;;  %v864_v2 = vld [vmem:[#allocation8 + $0x428] sm:$0xff]  ;;  %v881_v4 = vld [vmem:[#allocation8 + $0x4b0] sm:$0xff] }
  0xbe   : > { %v432_v6 = vpop.f32.mrf.mxu1  ;;  %v715_v7 = vmax.f32 %v413_v5, 0.0  ;;  %v899_v5 = vld [vmem:[#allocation8 + $0x540] sm:$0xff] }
  0xbf   : > { %v433_v8 = vadd.f32 %v432_v6, %v360_v3  ;;  %v1952_v3 = vld [vmem:[#allocation7 + $0x8] sm:$0xff]  ;;  %v916_v6 = vld [vmem:[#allocation8 + $0x5c8] sm:$0xff] }
  0xc0   : > { %1007 = vmatmul.f32.vlgmr.msra.gmra.mxu0 %v715_v7  ;;  %v863_v7 = vld [vmem:[#allocation8 + $0x420] sm:$0xff] }
  0xc1   : > { %v716_v11 = vmax.f32 %v433_v8, 0.0  ;;  %1151 = vmatpush.msra.mxu0 %v874_v9  ;;  %v880_v8 = vld [vmem:[#allocation8 + $0x4a8] sm:$0xff]  ;;  %v898_v9 = vld [vmem:[#allocation8 + $0x538] sm:$0xff] }
  0xc2   : > { %v452_v15 = vpop.f32.mrf.mxu2 }
  0xc3   : > { %v453_v16 = vadd.f32 %v452_v15, %v361_v10  ;;  %1027 = vmatmul.f32.vlgmr.msra.gmra.mxu1 %v716_v11  ;;  %1152 = vmatpush.msra.mxu0 %v873_v12  ;;  %v367_v10 = vperm.slane %v1952_v3, 0  ;;  %v915_v11 = vld [vmem:[#allocation8 + $0x5c0] sm:$0xff]  ;;  %v862_v12 = vld [vmem:[#allocation8 + $0x418] sm:$0xff] }
  0xc4   : > { %1171 = vmatpush.msra.mxu1 %v890_v13  ;;  %v472_v20 = vpop.f32.mrf.mxu3  ;;  %v879_v15 = vld [vmem:[#allocation8 + $0x4a0] sm:$0xff] }
  0xc5   : > { %v717_v19 = vmax.f32 %v453_v16, 0.0  ;;  %v473_v23 = vadd.f32 %v472_v20, %v362_v14  ;;  %1153 = vmatpush.msra.mxu0 %v872_v17  ;;  %v897_v14 = vld [vmem:[#allocation8 + $0x530] sm:$0xff]  ;;  %v914_v16 = vld [vmem:[#allocation8 + $0x5b8] sm:$0xff] }
  0xc6   : > { %1172 = vmatpush.msra.mxu1 %v889_v18  ;;  %v492_v31 = vpop.f32.mrf.mxu0  ;;  %v861_v17 = vld [vmem:[#allocation8 + $0x410] sm:$0xff]  ;;  %v368_v18 = vperm.slane %v1952_v3, 1  ;;  %v878_v20 = vld [vmem:[#allocation8 + $0x498] sm:$0xff] }
  0xc7   : > { %1047 = vmatmul.f32.vlgmr.msra.gmra.mxu2 %v717_v19  ;;  %v718_v27 = vmax.f32 %v473_v23, 0.0  ;;  %1154 = vmatpush.msra.mxu0 %v871_v21  ;;  %v493_v40 = vadd.f32 %v492_v31, %v363_v26  ;;  %v896_v21 = vld [vmem:[#allocation8 + $0x528] sm:$0xff]  ;;  %v913_v23 = vld [vmem:[#allocation8 + $0x5b0] sm:$0xff]  ;;  %v895_v26 = vld [vmem:[#allocation8 + $0x520] sm:$0xff] }
  0xc8   : > { %1173 = vmatpush.msra.mxu1 %v888_v22  ;;  %1191 = vmatpush.msra.mxu2 %v906_v24  ;;  %v512_v42 = vpop.f32.mrf.mxu1  ;;  %v860_v24 = vld [vmem:[#allocation8 + $0x408] sm:$0xff] }
  0xc9   : > { %1067 = vmatmul.f32.vlgmr.msra.gmra.mxu3 %v718_v27  ;;  %1155 = vmatpush.msra.mxu0 %v870_v25  ;;  %v513_v50 = vadd.f32 %v512_v42, %v364_v37  ;;  %v719_v53 = vmax.f32 %v493_v40, 0.0  ;;  %v877_v25 = vld [vmem:[#allocation8 + $0x490] sm:$0xff]  ;;  %v875_v37 = vld [vmem:[#allocation8 + $0x480] sm:$0xff]  ;;  %v910_v42 = vld [vmem:[#allocation8 + $0x598] sm:$0xff] }
  0xca   : > { %1174 = vmatpush.msra.mxu1 %v887_v28  ;;  %1192 = vmatpush.msra.mxu2 %v905_v29  ;;  %v532_v38 = vpop.f32.mrf.mxu2  ;;  %v912_v28 = vld [vmem:[#allocation8 + $0x5a8] sm:$0xff]  ;;  %v859_v29 = vld [vmem:[#allocation8 + $0x400] sm:$0xff] }
  0xcb   : > { %1211 = vmatpush.msra.mxu3 %v922_v32  ;;  %v533_v43 = vadd.f32 %v532_v38, %v365_v30  ;;  %1156 = vmatpush.msra.mxu0 %v869_v33  ;;  %v720_v59 = vmax.f32 %v513_v50, 0.0  ;;  %v369_v30 = vperm.slane %v1952_v3, 2  ;;  %v876_v32 = vld [vmem:[#allocation8 + $0x488] sm:$0xff]  ;;  %v894_v33 = vld [vmem:[#allocation8 + $0x518] sm:$0xff]  ;;  %v370_v38 = vperm.slane %v1952_v3, 3 }
  0xcc   : > { %1175 = vmatpush.msra.mxu1 %v886_v34  ;;  %1193 = vmatpush.msra.mxu2 %v904_v35  ;;  %v911_v35 = vld [vmem:[#allocation8 + $0x5a0] sm:$0xff] }
  0xcd   : > { %v552_v46 = vpop.f32.mrf.mxu3  ;;  %v721_v48 = vmax.f32 %v533_v43, 0.0  ;;  %1212 = vmatpush.msra.mxu3 %v921_v39  ;;  %1157 = vmatpush.msra.mxu0 %v868_v41  ;;  %v893_v41 = vld [vmem:[#allocation8 + $0x510] sm:$0xff] }
  0xce   : > { %v553_v49 = vadd.f32 %v552_v46, %v366_v36  ;;  %1176 = vmatpush.msra.mxu1 %v885_v44  ;;  %1194 = vmatpush.msra.mxu2 %v903_v45  ;;  %v938_v36 = vld [vmem:[#allocation8 + $0x678] sm:$0xff]  ;;  %v937_v44 = vld [vmem:[#allocation8 + $0x670] sm:$0xff]  ;;  %v892_v46 = vld [vmem:[#allocation8 + $0x508] sm:$0xff] }
  0xcf   : > { %1213 = vmatpush.msra.mxu3 %v920_v47  ;;  %1127 = vmatmul.f32.vlgmr.msrb.gmra.mxu2 %v721_v48  ;;  %v572_v13 = vpop.f32.mrf.mxu0  ;;  %v954_v45 = vld [vmem:[#allocation8 + $0x6f8] sm:$0xff]  ;;  %v909_v48 = vld [vmem:[#allocation8 + $0x590] sm:$0xff] }
  0xd0   : > { %v722_v56 = vmax.f32 %v553_v49, 0.0  ;;  %1158 = vmatpush.msra.mxu0 %v867_v51  ;;  %1177 = vmatpush.msra.mxu1 %v884_v52  ;;  %v573_v19 = vadd.f32 %v572_v13, %v367_v10  ;;  %v936_v49 = vld [vmem:[#allocation8 + $0x668] sm:$0xff]  ;;  %v953_v51 = vld [vmem:[#allocation8 + $0x6f0] sm:$0xff]  ;;  %v891_v52 = vld [vmem:[#allocation8 + $0x500] sm:$0xff] }
  0xd1   : > { %1195 = vmatpush.msra.mxu2 %v902_v54  ;;  %1214 = vmatpush.msra.mxu3 %v919_v55  ;;  %v592_v22 = vpop.f32.mrf.mxu1  ;;  %v935_v54 = vld [vmem:[#allocation8 + $0x660] sm:$0xff]  ;;  %v952_v55 = vld [vmem:[#allocation8 + $0x6e8] sm:$0xff]  ;;  %v966_v10 = vld [vmem:[#allocation8 + $0x758] sm:$0xff] }
  0xd2   : > { %1087 = vmatmul.f32.vlgmr.msrb.gmra.mxu0 %v719_v53  ;;  %1147 = vmatmul.f32.vlgmr.msrb.gmra.mxu3 %v722_v56  ;;  %v593_v27 = vadd.f32 %v592_v22, %v368_v18  ;;  %v723_v31 = vmax.f32 %v573_v19, 0.0  ;;  %v908_v53 = vld [vmem:[#allocation8 + $0x588] sm:$0xff]  ;;  %v947_v13 = vld [vmem:[#allocation8 + $0x6c0] sm:$0xff]  ;;  %v981_v19 = vld [vmem:[#allocation8 + $0x7d0] sm:$0xff] }
  0xd3   : > { %1159 = vmatpush.msra.mxu0 %v866_v57  ;;  %1178 = vmatpush.msra.mxu1 %v883_v58  ;;  %v970_v57 = vld [vmem:[#allocation8 + $0x778] sm:$0xff]  ;;  %v907_v58 = vld [vmem:[#allocation8 + $0x580] sm:$0xff]  ;;  %v964_v18 = vld [vmem:[#allocation8 + $0x748] sm:$0xff] }
  0xd4   : > { %1196 = vmatpush.msra.mxu2 %v901_v60  ;;  %1215 = vmatpush.msra.mxu3 %v918_v61  ;;  %v724_v39 = vmax.f32 %v593_v27, 0.0  ;;  %v951_v60 = vld [vmem:[#allocation8 + $0x6e0] sm:$0xff]  ;;  %v969_v61 = vld [vmem:[#allocation8 + $0x770] sm:$0xff]  ;;  %v371_v27 = vperm.slane %v1952_v3, 4 }
  0xd5   : > { %1107 = vmatmul.f32.vlgmr.msrb.gmra.mxu1 %v720_v59  ;;  %1160 = vmatpush.msra.mxu0 %v865_v62  ;;  %v934_v59 = vld [vmem:[#allocation8 + $0x658] sm:$0xff]  ;;  %v963_v22 = vld [vmem:[#allocation8 + $0x740] sm:$0xff] }
  0xd6   : > { %1179 = vmatpush.msra.mxu1 %v882_v63  ;;  %1197 = vmatpush.msra.mxu2 %v900_v0  ;;  %v612_v34 = vpop.f32.mrf.mxu2  ;;  %v986_v62 = vld [vmem:[#allocation8 + $0x7f8] sm:$0xff]  ;;  %v933_v63 = vld [vmem:[#allocation8 + $0x650] sm:$0xff] }
  0xd7   : > { %1216 = vmatpush.msra.mxu3 %v917_v1  ;;  %1161 = vmatpush.msra.mxu0 %v864_v2  ;;  %v613_v40 = vadd.f32 %v612_v34, %v369_v30  ;;  %v950_v0 = vld [vmem:[#allocation8 + $0x6d8] sm:$0xff]  ;;  %v968_v1 = vld [vmem:[#allocation8 + $0x768] sm:$0xff]  ;;  %v985_v2 = vld [vmem:[#allocation8 + $0x7f0] sm:$0xff] }
  0xd8   : > { %1180 = vmatpush.msra.mxu1 %v881_v4  ;;  %1198 = vmatpush.msra.mxu2 %v899_v5  ;;  %v632_v43 = vpop.f32.mrf.mxu3  ;;  %v932_v4 = vld [vmem:[#allocation8 + $0x648] sm:$0xff]  ;;  %v949_v5 = vld [vmem:[#allocation8 + $0x6d0] sm:$0xff]  ;;  %v978_v34 = vld [vmem:[#allocation8 + $0x7b8] sm:$0xff] }
  0xd9   : > { %1217 = vmatpush.msra.mxu3 %v916_v6  ;;  %1162 = vmatpush.msra.mxu0 %v863_v7  ;;  %v633_v47 = vadd.f32 %v632_v43, %v370_v38  ;;  %v725_v50 = vmax.f32 %v613_v40, 0.0  ;;  %v967_v6 = vld [vmem:[#allocation8 + $0x760] sm:$0xff]  ;;  %v984_v7 = vld [vmem:[#allocation8 + $0x7e8] sm:$0xff]  ;;  %v942_v38 = vld [vmem:[#allocation8 + $0x698] sm:$0xff] }
  0xda   : > { %1181 = vmatpush.msra.mxu1 %v880_v8  ;;  %1199 = vmatpush.msra.mxu2 %v898_v9  ;;  %v931_v8 = vld [vmem:[#allocation8 + $0x640] sm:$0xff]  ;;  %v948_v9 = vld [vmem:[#allocation8 + $0x6c8] sm:$0xff]  ;;  %v652_v30 = vpop.f32.mrf.mxu0  ;;  %v977_v40 = vld [vmem:[#allocation8 + $0x7b0] sm:$0xff] }
  0xdb   : > { %1218 = vmatpush.msra.mxu3 %v915_v11  ;;  %1163 = vmatpush.msra.mxu0 %v862_v12  ;;  %v726_v56 = vmax.f32 %v633_v47, 0.0  ;;  %v983_v11 = vld [vmem:[#allocation8 + $0x7e0] sm:$0xff]  ;;  %v930_v12 = vld [vmem:[#allocation8 + $0x638] sm:$0xff]  ;;  %v941_v43 = vld [vmem:[#allocation8 + $0x690] sm:$0xff] }
  0xdc   : > { %1182 = vmatpush.msra.mxu1 %v879_v15  ;;  %1200 = vmatpush.msra.mxu2 %v897_v14  ;;  %v965_v15 = vld [vmem:[#allocation8 + $0x750] sm:$0xff]  ;;  %v982_v14 = vld [vmem:[#allocation8 + $0x7d8] sm:$0xff]  ;;  %v923_v47 = vld [vmem:[#allocation8 + $0x600] sm:$0xff] }
  0xdd   : > { %1219 = vmatpush.msra.mxu3 %v914_v16  ;;  %1164 = vmatpush.msra.mxu0 %v861_v17  ;;  %v929_v16 = vld [vmem:[#allocation8 + $0x630] sm:$0xff]  ;;  %v946_v17 = vld [vmem:[#allocation8 + $0x6b8] sm:$0xff] }
  0xde   : > { %1183 = vmatpush.msra.mxu1 %v878_v20  ;;  %1201 = vmatpush.msra.mxu2 %v896_v21  ;;  %v928_v20 = vld [vmem:[#allocation8 + $0x628] sm:$0xff]  ;;  %v945_v21 = vld [vmem:[#allocation8 + $0x6b0] sm:$0xff] }
  0xdf   : > { %1220 = vmatpush.msra.mxu3 %v913_v23  ;;  %1165 = vmatpush.msra.mxu0 %v860_v24  ;;  %v980_v23 = vld [vmem:[#allocation8 + $0x7c8] sm:$0xff]  ;;  %v927_v24 = vld [vmem:[#allocation8 + $0x620] sm:$0xff] }
  0xe0   : > { %1184 = vmatpush.msra.mxu1 %v877_v25  ;;  %1202 = vmatpush.msra.mxu2 %v895_v26  ;;  %v944_v25 = vld [vmem:[#allocation8 + $0x6a8] sm:$0xff]  ;;  %v962_v26 = vld [vmem:[#allocation8 + $0x738] sm:$0xff] }
  0xe1   : > { %1221 = vmatpush.msra.mxu3 %v912_v28  ;;  %1166 = vmatpush.msra.mxu0 %v859_v29  ;;  %v979_v28 = vld [vmem:[#allocation8 + $0x7c0] sm:$0xff]  ;;  %v926_v29 = vld [vmem:[#allocation8 + $0x618] sm:$0xff] }
  0xe2   : > { %1185 = vmatpush.msra.mxu1 %v876_v32  ;;  %1203 = vmatpush.msra.mxu2 %v894_v33  ;;  %v961_v32 = vld [vmem:[#allocation8 + $0x730] sm:$0xff]  ;;  %v372_v33 = vperm.slane %v1952_v3, 5 }
  0xe3   : > { %1222 = vmatpush.msra.mxu3 %v911_v35  ;;  %1167 = vmatmul.f32.vlgmr.msra.gmra.mxu0 %v723_v31  ;;  %v943_v31 = vld [vmem:[#allocation8 + $0x6a0] sm:$0xff]  ;;  %v925_v35 = vld [vmem:[#allocation8 + $0x610] sm:$0xff] }
  0xe4   : > { %1231 = vmatpush.msrb.mxu0 %v938_v36  ;;  %1186 = vmatpush.msra.mxu1 %v875_v37  ;;  %v672_v36 = vpop.f32.mrf.mxu1  ;;  %v653_v37 = vadd.f32 %v652_v30, %v371_v27 }
  0xe5   : > { %1204 = vmatpush.msra.mxu2 %v893_v41  ;;  %1223 = vmatpush.msra.mxu3 %v910_v42  ;;  %v924_v41 = vld [vmem:[#allocation8 + $0x608] sm:$0xff]  ;;  %v673_v42 = vadd.f32 %v672_v36, %v372_v33 }
  0xe6   : > { %1187 = vmatmul.f32.vlgmr.msra.gmra.mxu1 %v724_v39  ;;  %1232 = vmatpush.msrb.mxu0 %v937_v44  ;;  %v960_v39 = vld [vmem:[#allocation8 + $0x728] sm:$0xff]  ;;  %v959_v44 = vld [vmem:[#allocation8 + $0x720] sm:$0xff] }
  0xe7   : > { %1251 = vmatpush.msrb.mxu1 %v954_v45  ;;  %1205 = vmatpush.msra.mxu2 %v892_v46  ;;  %v373_v45 = vperm.slane %v1952_v3, 6  ;;  %v976_v46 = vld [vmem:[#allocation8 + $0x7a8] sm:$0xff] }
  0xe8   : > { %1224 = vmatpush.msra.mxu3 %v909_v48  ;;  %1233 = vmatpush.msrb.mxu0 %v936_v49  ;;  %v692_v48 = vpop.f32.mrf.mxu2  ;;  %v727_v49 = vmax.f32 %v653_v37, 0.0 }
  0xe9   : > { %1252 = vmatpush.msrb.mxu1 %v953_v51  ;;  %1206 = vmatpush.msra.mxu2 %v891_v52  ;;  %v958_v51 = vld [vmem:[#allocation8 + $0x718] sm:$0xff]  ;;  %v975_v52 = vld [vmem:[#allocation8 + $0x7a0] sm:$0xff] }
  0xea   : > { %1225 = vmatpush.msra.mxu3 %v908_v53  ;;  %1207 = vmatmul.f32.vlgmr.msra.gmra.mxu2 %v725_v50  ;;  %v940_v50 = vld [vmem:[#allocation8 + $0x688] sm:$0xff]  ;;  %v374_v53 = vperm.slane %v1952_v3, 7  ;;  %v955_v3 = vld [vmem:[#allocation8 + $0x700] sm:$0xff] }
  0xeb   : > { %1234 = vmatpush.msrb.mxu0 %v935_v54  ;;  %1253 = vmatpush.msrb.mxu1 %v952_v55  ;;  %v728_v54 = vmax.f32 %v673_v42, 0.0  ;;  %v693_v55 = vadd.f32 %v692_v48, %v373_v45 }
  0xec   : > { %1271 = vmatpush.msrb.mxu2 %v970_v57  ;;  %1226 = vmatpush.msra.mxu3 %v907_v58  ;;  %v957_v57 = vld [vmem:[#allocation8 + $0x710] sm:$0xff]  ;;  %v712_v58 = vpop.f32.mrf.mxu3 }
  0xed   : > { %1227 = vmatmul.f32.vlgmr.msra.gmra.mxu3 %v726_v56  ;;  %1235 = vmatpush.msrb.mxu0 %v934_v59  ;;  %v939_v56 = vld [vmem:[#allocation8 + $0x680] sm:$0xff]  ;;  %v974_v59 = vld [vmem:[#allocation8 + $0x798] sm:$0xff] }
  0xee   : > { %1254 = vmatpush.msrb.mxu1 %v951_v60  ;;  %1272 = vmatpush.msrb.mxu2 %v969_v61  ;;  %v956_v60 = vld [vmem:[#allocation8 + $0x708] sm:$0xff]  ;;  %v713_v61 = vadd.f32 %v712_v58, %v374_v53 }
  0xef   : > { %1291 = vmatpush.msrb.mxu3 %v986_v62  ;;  %1236 = vmatpush.msrb.mxu0 %v933_v63  ;;  %v973_v62 = vld [vmem:[#allocation8 + $0x790] sm:$0xff]  ;;  %v729_v63 = vmax.f32 %v693_v55, 0.0 }
  0xf0   : > { %1255 = vmatpush.msrb.mxu1 %v950_v0  ;;  %1273 = vmatpush.msrb.mxu2 %v968_v1  ;;  %v972_v0 = vld [vmem:[#allocation8 + $0x788] sm:$0xff]  ;;  %v730_v1 = vmax.f32 %v713_v61, 0.0 }
  0xf1   : > { %1292 = vmatpush.msrb.mxu3 %v985_v2  ;;  %1237 = vmatpush.msrb.mxu0 %v932_v4  ;;  %v971_v2 = vld [vmem:[#allocation8 + $0x780] sm:$0xff] }
  0xf2   : > { %1256 = vmatpush.msrb.mxu1 %v949_v5  ;;  %1274 = vmatpush.msrb.mxu2 %v967_v6  ;;  %v1541_v4 = vld [vmem:[%s2004_s4] ss:$0 sm:$0xff] }
  0xf3   : > { %1293 = vmatpush.msrb.mxu3 %v984_v7  ;;  %1238 = vmatpush.msrb.mxu0 %v931_v8 }
  0xf4   : > { %1257 = vmatpush.msrb.mxu1 %v948_v9  ;;  %1275 = vmatpush.msrb.mxu2 %v966_v10 }
  0xf5   : > { %1294 = vmatpush.msrb.mxu3 %v983_v11  ;;  %1239 = vmatpush.msrb.mxu0 %v930_v12 }
  0xf6   : > { %1258 = vmatpush.msrb.mxu1 %v947_v13  ;;  %1276 = vmatpush.msrb.mxu2 %v965_v15 }
  0xf7   : > { %1295 = vmatpush.msrb.mxu3 %v982_v14  ;;  %1240 = vmatpush.msrb.mxu0 %v929_v16 }
  0xf8   : > { %1259 = vmatpush.msrb.mxu1 %v946_v17  ;;  %1277 = vmatpush.msrb.mxu2 %v964_v18 }
  0xf9   : > { %1296 = vmatpush.msrb.mxu3 %v981_v19  ;;  %1241 = vmatpush.msrb.mxu0 %v928_v20 }
  0xfa   : > { %1260 = vmatpush.msrb.mxu1 %v945_v21  ;;  %1278 = vmatpush.msrb.mxu2 %v963_v22 }
  0xfb   : > { %1297 = vmatpush.msrb.mxu3 %v980_v23  ;;  %1242 = vmatpush.msrb.mxu0 %v927_v24 }
  0xfc   : > { %1261 = vmatpush.msrb.mxu1 %v944_v25  ;;  %1279 = vmatpush.msrb.mxu2 %v962_v26 }
  0xfd   : > { %1298 = vmatpush.msrb.mxu3 %v979_v28  ;;  %1243 = vmatpush.msrb.mxu0 %v926_v29 }
  0xfe   : > { %1262 = vmatpush.msrb.mxu1 %v943_v31  ;;  %1280 = vmatpush.msrb.mxu2 %v961_v32 }
  0xff   : > { %1299 = vmatpush.msrb.mxu3 %v978_v34  ;;  %1244 = vmatpush.msrb.mxu0 %v925_v35 }
 0x100   : > { %1263 = vmatpush.msrb.mxu1 %v942_v38  ;;  %1281 = vmatpush.msrb.mxu2 %v960_v39 }
 0x101   : > { %1300 = vmatpush.msrb.mxu3 %v977_v40  ;;  %1245 = vmatpush.msrb.mxu0 %v924_v41 }
 0x102   : > { %1264 = vmatpush.msrb.mxu1 %v941_v43  ;;  %1282 = vmatpush.msrb.mxu2 %v959_v44 }
 0x103   : > { %1301 = vmatpush.msrb.mxu3 %v976_v46  ;;  %1246 = vmatpush.msrb.mxu0 %v923_v47 }
 0x104   : > { %1265 = vmatpush.msrb.mxu1 %v940_v50  ;;  %1283 = vmatpush.msrb.mxu2 %v958_v51 }
 0x105   : > { %1302 = vmatpush.msrb.mxu3 %v975_v52  ;;  %1247 = vmatmul.f32.vlgmr.msrb.gmra.mxu0 %v727_v49 }
 0x106   : > { %1266 = vmatpush.msrb.mxu1 %v939_v56  ;;  %1284 = vmatpush.msrb.mxu2 %v957_v57 }
 0x107   : > { %1303 = vmatpush.msrb.mxu3 %v974_v59  ;;  %1267 = vmatmul.f32.vlgmr.msrb.gmra.mxu1 %v728_v54 }
 0x108   : > { %1285 = vmatpush.msrb.mxu2 %v956_v60 }
 0x109   : > { %1304 = vmatpush.msrb.mxu3 %v973_v62 }
 0x10a   : > { %1286 = vmatpush.msrb.mxu2 %v955_v3 }
 0x10b   : > { %1305 = vmatpush.msrb.mxu3 %v972_v0  ;;  %1287 = vmatmul.f32.vlgmr.msrb.gmra.mxu2 %v729_v63 }
 0x10d   : > { %1306 = vmatpush.msrb.mxu3 %v971_v2 }
 0x10e   : > { %1307 = vmatmul.f32.vlgmr.msrb.gmra.mxu3 %v730_v1 }
 0x13d   : > { %v1008_v5 = vpop.f32.mrf.mxu0 }
 0x13e   : > { %v1009_v6 = vadd.f32 %v1541_v4, %v1008_v5 }
 0x140   : > { %v1028_v7 = vpop.f32.mrf.mxu1 }
 0x141   : > { %v1029_v8 = vadd.f32 %v1028_v7, %v1009_v6 }
 0x14a   : > { %v1048_v9 = vpop.f32.mrf.mxu2 }
 0x14b   : > { %v1049_v10 = vadd.f32 %v1048_v9, %v1029_v8 }
 0x14c   : > { %v1068_v11 = vpop.f32.mrf.mxu3 }
 0x14d   : > { %v1069_v12 = vadd.f32 %v1068_v11, %v1049_v10 }
 0x14f   : > { %v1088_v13 = vpop.f32.mrf.mxu0 }
 0x150   : > { %v1089_v15 = vadd.f32 %v1088_v13, %v1069_v12 }
 0x152   : > { %v1108_v14 = vpop.f32.mrf.mxu1  ;;  %v1128_v17 = vpop.f32.mrf.mxu2 }
 0x153   : > { %v1109_v16 = vadd.f32 %v1108_v14, %v1089_v15 }
 0x155   : > { %v1129_v18 = vadd.f32 %v1128_v17, %v1109_v16  ;;  %v1148_v19 = vpop.f32.mrf.mxu3 }
 0x157   : > { %v1149_v21 = vadd.f32 %v1148_v19, %v1129_v18 }
 0x160   : > { %v1168_v20 = vpop.f32.mrf.mxu0 }
 0x161   : > { %v1169_v22 = vadd.f32 %v1168_v20, %v1149_v21 }
 0x163   : > { %v1188_v23 = vpop.f32.mrf.mxu1 }
 0x164   : > { %v1189_v25 = vadd.f32 %v1188_v23, %v1169_v22 }
 0x16d   : > { %v1208_v24 = vpop.f32.mrf.mxu2 }
 0x16e   : > { %v1209_v26 = vadd.f32 %v1208_v24, %v1189_v25 }
 0x170   : > { %v1228_v27 = vpop.f32.mrf.mxu3 }
 0x171   : > { %v1229_v29 = vadd.f32 %v1228_v27, %v1209_v26 }
 0x182   : > { %v1248_v28 = vpop.f32.mrf.mxu0 }
 0x183   : > { %v1249_v30 = vadd.f32 %v1248_v28, %v1229_v29 }
 0x184   : > { %v1268_v31 = vpop.f32.mrf.mxu1 }
 0x185   : > { %v1269_v32 = vadd.f32 %v1268_v31, %v1249_v30 }
 0x18e   : > { %v1288_v33 = vpop.f32.mrf.mxu2 }
 0x18f   : > { %v1289_v34 = vadd.f32 %v1288_v33, %v1269_v32 }
 0x191   : > { %v1308_v35 = vpop.f32.mrf.mxu3 }
 0x192   : > { %v1309_v36 = vadd.f32 %v1308_v35, %v1289_v34 }
 0x194   : > { %1311 = vst [vmem:[%s289_s27] sm:$0xff] %v1309_v36 }
 0x195   : > { %1689 = shalt.err (!%p1686_p9)
}
 0x196   : > { %1475 = dma.vmem_to_hbm [thread:$0]  (%p1856_p4), %s1326_s9, 128, %s1328_s10, %s1313_s11  }
 0x197 PF: > { %s1339_s6 = sand.u32 1, %s1724_s18   ;;  %p2013_p10 = scmp.ge.s32.totalorder %s1736_s21, 2 }
 0x198   : > { %s1340_s30 = scalar_lea.sflag [#allocation4], %s1339_s6 }
 0x199   : > { %p1492_p13 = pnand %p2013_p10, %p1860_p6 }
 0x19b   : > { %p1493_p11 = pneg %p1492_p13 }
 0x19d   : > { %1719 = dma.done.wait (%p1493_p11), %s1340_s30, 128  }
 0x19e   : > { %1721 = vsyncadd (%p1493_p11), %s1340_s30, 4294967168  ;;  %p20_p0 = scmp.ge.s32.totalorder %s1830_s23, 4   ;;  %s2014_s18 = smov %s1728_s19 }
 0x19f   : > { %s2015_s19 = smov %s1732_s20  ;;  %s2016_s20 = smov %s1841_s28 }
 0x1a0   : > { %s2017_s21 = smov %s1830_s23  ;;  %22 = sbr.rel (!%p20_p0) target bundleno = 7 (0x7), region = 97 }
 0x1a5   :  { %1346 = vsyncpa [#allocation3], 1 }
 0x1a6   :  { %1348 = vsyncpa [#allocation3 + $0x1], 1 }
 0x1a7   :  { %1349 = vsyncpa [#allocation6], 1 }
 0x1a8   :  { %1350 = vsyncpa [#allocation9], 1 }
 0x1a9   :  { %1351 = vsyncpa [#allocation4], 1 }
 0x1aa   :  { %1353 = vsyncpa [#allocation4 + $0x1], 1 }

</bundles_post_ra>
